<compile_context>
chip_gen: v7x
topology: tpu7x:2x2x1
jax: 0.10.0
libtpu: 0.0.40
codegen_flags: <defaults>
</compile_context>

<pallas_src>
import functools

import jax
import jax.numpy as jnp
from jax.experimental import pallas as pl
from jax.experimental.pallas import tpu as pltpu

_LANE = 128


def _round_up(v, m):
    return ((v + m - 1) // m) * m


def _choose_row_block(ho, wo, target_m=512):
    """Largest divisor rb of ho with rb*wo a multiple of 128 and <= target_m.

    Falls back to the whole image (block dim == full dim is always legal)."""
    best = ho
    for rb in range(1, ho + 1):
        if ho % rb:
            continue
        m = rb * wo
        if m % _LANE == 0 and m <= target_m:
            best = rb
    return best


def _vmem_limit_bytes(per_step_bytes):
    """~85% of physical VMEM (query hardware, conservative 64 MiB fallback)."""
    cap = 64 * 1024 * 1024
    try:
        info = pltpu.get_tpu_info()
        cap = int(getattr(info, "vmem_capacity_bytes", cap)) or cap
    except Exception:
        pass
    want = max(2 * per_step_bytes, 32 * 1024 * 1024)
    return int(min(want, int(cap * 0.85)))


# ----------------------------------------------------------------------------
# Kernel 1 (init-time, one-off): per-output-channel asymmetric min/max weight
# quantization (w_bits) + global asymmetric min/max bias quantization (32 bit).
# Weight layout: (K, Cout_pad) with K = Kh*Kw*Cin tap-major, channels on lanes.
# ----------------------------------------------------------------------------
def _quant_kernel(w_ref, b_full_ref, b_blk_ref, qw_ref, qb_ref, *,
                  w_bits, b_bits, cout, cblk):
    w = w_ref[...]                                        # (K, cblk) f32
    if w_bits == 0:
        qw_ref[...] = jnp.zeros(w.shape, qw_ref.dtype)
    else:
        ch_max = jnp.max(w, axis=0, keepdims=True)
        ch_min = jnp.min(w, axis=0, keepdims=True)
        ch_range = ch_max - ch_min
        ch_range = jnp.where(ch_range == 0.0, 1.0, ch_range)
        s_w = ch_range / (2.0 ** w_bits - 1.0)
        qw_ref[...] = (jnp.round(w / s_w) * s_w).astype(qw_ref.dtype)

    # Bias: global min/max over the *real* Cout entries (mask lane padding).
    b_full = b_full_ref[...]                              # (1, Cout_pad) f32
    full_ids = jax.lax.broadcasted_iota(jnp.int32, b_full.shape, 1)
    valid = full_ids < cout
    b_max = jnp.max(jnp.where(valid, b_full, -jnp.inf), axis=1, keepdims=True)
    b_min = jnp.min(jnp.where(valid, b_full, jnp.inf), axis=1, keepdims=True)
    s_b = (b_max - b_min) / (2.0 ** b_bits - 1.0)
    # Guard: the reference divides by zero (NaN/inf) when all bias entries are
    # equal; here the bias passes through unchanged in that case.
    s_b = jnp.where(s_b == 0.0, 1.0, s_b)
    b_blk = b_blk_ref[...]                                # (1, cblk) f32
    qb = jnp.round(b_blk / s_b) * s_b
    blk_ids = (pl.program_id(0) * cblk
               + jax.lax.broadcasted_iota(jnp.int32, b_blk.shape, 1))
    qb_ref[...] = jnp.where(blk_ids < cout, qb, 0.0)


def quantize_weight_and_bias(w2, b_row, *, w_bits, cout):
    k, cout_pad = w2.shape
    cblk = min(_LANE, cout_pad)
    kernel = functools.partial(_quant_kernel, w_bits=int(w_bits), b_bits=32,
                               cout=int(cout), cblk=int(cblk))
    qw, qb = pl.pallas_call(
        kernel,
        grid=(cout_pad // cblk,),
        in_specs=[
            pl.BlockSpec((k, cblk), lambda j: (0, j)),
            pl.BlockSpec((1, cout_pad), lambda j: (0, 0)),   # full bias row
            pl.BlockSpec((1, cblk), lambda j: (0, j)),       # bias block
        ],
        out_specs=[
            pl.BlockSpec((k, cblk), lambda j: (0, j)),
            pl.BlockSpec((1, cblk), lambda j: (0, j)),
        ],
        out_shape=(
            jax.ShapeDtypeStruct((k, cout_pad), jnp.bfloat16),
            jax.ShapeDtypeStruct((1, cout_pad), jnp.float32),
        ),
        compiler_params=pltpu.CompilerParams(
            dimension_semantics=("parallel",)),
    )(w2, b_row, b_row)
    return qw, qb


# ----------------------------------------------------------------------------
# Kernel 2: fused, im2col-in-VMEM conv.
#   grid = (N, row_blocks, cout_blocks); image resident per N step.
#   At cout-block 0 the (rb_rows, Wo, K_pad) patch is built in a VMEM scratch
#   with plain 3-D window copies; each cout block then does ONE bf16 matmul
#   (M = rb_rows*Wo, K = K_pad, N = cblk) with fp32 result, adds bias,
#   transposes to channel-major and stores only round_up(Cout, 8) channels.
# ----------------------------------------------------------------------------
def _fused_conv_kernel(x_ref, w_ref, b_ref, o_ref, patch_ref, *,
                       kh, kw, dil, rb_rows, wo, k, out_rows):
    r = pl.program_id(1)
    cb = pl.program_id(2)
    cin = x_ref.shape[-1]
    k_pad = patch_ref.shape[-1]
    m = rb_rows * wo
    row0 = r * rb_rows

    @pl.when(cb == 0)
    def _build_patch():
        # Zero the K lane padding once per image; the matching weight rows are
        # zero so those columns contribute nothing (and never see stale NaNs).
        @pl.when(r == 0)
        def _():
            if k_pad > k:
                patch_ref[:, :, k:] = jnp.zeros(
                    (rb_rows, wo, k_pad - k), patch_ref.dtype)
        # Direct 3-D window copies: no (Ho*Wo, Cin) reshape relayout per tap.
        for t in range(kh * kw):
            dy, dx = divmod(t, kw)
            win = x_ref[pl.ds(row0 + dy * dil, rb_rows),
                        dx * dil:dx * dil + wo, :]
            patch_ref[:, :, t * cin:(t + 1) * cin] = win

    # Single MXU matmul with K = Cin*Kh*Kw (lane-padded); no accumulator chain.
    res = jnp.dot(patch_ref[...].reshape(m, k_pad), w_ref[...],
                  preferred_element_type=jnp.float32)
    res = res + b_ref[...]
    # Channel-major store: Cout on sublanes, spatial on lanes (low write amp,
    # and the host NHWC->NCHW transpose pass disappears).
    o_ref[...] = jnp.transpose(res)[:out_rows, :]


def fused_conv(x_pad, qw, qb, *, cout, kh, kw, dil, ho, wo):
    n, hp, wp, cin = x_pad.shape
    k_pad, cout_pad = qw.shape
    k = cin * kh * kw
    assert k_pad == _round_up(k, _LANE)

    rb_rows = _choose_row_block(ho, wo)
    n_rb = ho // rb_rows
    m_blk = rb_rows * wo
    cblk = 256 if (cout_pad % 256 == 0 and cout_pad > 128) else 128
    n_cb = cout_pad // cblk
    out_rows = _round_up(cout, 8) if n_cb == 1 else cblk
    cout_out = out_rows * n_cb

    # Per-step VMEM: double-buffered x / w / bias / out blocks + patch scratch
    # + fp32 matmul result / transpose temporaries.
    per_step = (2 * hp * wp * cin * 2
                + 2 * k_pad * cblk * 2
                + 4 * cblk * 4
                + 2 * out_rows * m_blk * 4
                + m_blk * k_pad * 2
                + 2 * m_blk * cblk * 4)
    vmem_limit = _vmem_limit_bytes(per_step)

    kernel = functools.partial(_fused_conv_kernel, kh=int(kh), kw=int(kw),
                               dil=int(dil), rb_rows=int(rb_rows), wo=int(wo),
                               k=int(k), out_rows=int(out_rows))
    cost = pl.CostEstimate(
        flops=2 * n * ho * wo * k * cout,
        transcendentals=0,
        bytes_accessed=(n * hp * wp * cin * 2 + k_pad * cout_pad * 2
                        + cout_pad * 4 + n * cout_out * ho * wo * 4))

    return pl.pallas_call(
        kernel,
        grid=(n, n_rb, n_cb),
        in_specs=[
            pl.BlockSpec((None, hp, wp, cin), lambda i, r, j: (i, 0, 0, 0)),
            pl.BlockSpec((k_pad, cblk), lambda i, r, j: (0, j)),
            pl.BlockSpec((1, cblk), lambda i, r, j: (0, j)),
        ],
        out_specs=pl.BlockSpec((None, out_rows, m_blk),
                               lambda i, r, j: (i, j, r)),
        out_shape=jax.ShapeDtypeStruct((n, cout_out, ho * wo), jnp.float32),
        scratch_shapes=[pltpu.VMEM((rb_rows, wo, k_pad), jnp.bfloat16)],
        compiler_params=pltpu.CompilerParams(
            dimension_semantics=("parallel", "arbitrary", "arbitrary"),
            vmem_limit_bytes=vmem_limit),
        cost_estimate=cost,
    )(x_pad, qw, qb)


# ----------------------------------------------------------------------------
# Forward glue (jitted; host-side layout ops fuse into single XLA passes).
# ----------------------------------------------------------------------------
def quant_mix_chan_conv2d_forward(x, qw, qb, *, cout, kh, kw, stride, padding,
                                  dilation):
    n, cin, h, w = x.shape
    ho = (h + 2 * padding - dilation * (kh - 1) - 1) // stride + 1
    wo = (w + 2 * padding - dilation * (kw - 1) - 1) // stride + 1

    # NCHW -> NHWC, spatial zero-pad, bf16 cast (one fused pass).
    x_nhwc = jnp.transpose(x, (0, 2, 3, 1))
    x_pad = jnp.pad(x_nhwc, ((0, 0), (padding, padding), (padding, padding),
                             (0, 0))).astype(jnp.bfloat16)

    out = fused_conv(x_pad, qw, qb, cout=cout, kh=kh, kw=kw, dil=dilation,
                     ho=ho, wo=wo)
    # Output is already channel-major (N, Cout_round8, Ho*Wo): slice the real
    # channels and do a free reshape -- no NHWC->NCHW transpose pass needed.
    return out[:, :cout, :].reshape(n, cout, ho, wo)


class QuantMixChanConv2dPallas:
    """JAX/Pallas port of QuantMixChanConv2d: per-output-channel asymmetric
    min/max weight quantization at `bits`, 32-bit bias quantization, conv2d.

    Quantization is hoisted to construction time (parameters are static)."""

    def __init__(self, inplane, outplane, bits, kernel_size, stride=1,
                 padding=0, dilation=1, groups=1, key=None):
        assert groups == 1  # TODO(synk): grouped convolution not implemented
        assert stride == 1  # TODO(synk): stride > 1 (strided window gather) not implemented
        self.bits = int(bits)
        self.stride = stride
        self.padding = padding
        self.dilation = dilation
        k_w, k_b = jax.random.split(key)
        # deterministic synthetic conv parameters (shapes match nn.Conv2d)
        self.weight = 0.1 * jax.random.normal(
            k_w, (outplane, inplane, kernel_size, kernel_size), jnp.float32)
        self.bias = 0.1 * jax.random.normal(k_b, (outplane,), jnp.float32)
        # TODO(synk): Conv2d(bias=False) (bias is None) path not implemented.

        # Hoisted quantization: run the quant kernel once at init.
        self.qw, self.qb = self._prepare_quantized()

        self._fwd = jax.jit(functools.partial(
            quant_mix_chan_conv2d_forward, cout=int(outplane),
            kh=int(kernel_size), kw=int(kernel_size), stride=stride,
            padding=padding, dilation=dilation))

    def _prepare_quantized(self):
        cout, cin, kh, kw = self.weight.shape
        k = cin * kh * kw
        k_pad = _round_up(k, _LANE)
        cout_pad = _round_up(cout, _LANE)
        # OIHW -> tap-major (Kh, Kw, Cin, Cout) -> (K, Cout), pad Cout lanes.
        w2 = jnp.transpose(self.weight, (2, 3, 1, 0)).reshape(k, cout)
        w2 = jnp.pad(w2, ((0, 0), (0, cout_pad - cout)))
        b_row = jnp.pad(self.bias, (0, cout_pad - cout)).reshape(1, cout_pad)
        qw, qb = quantize_weight_and_bias(w2, b_row, w_bits=self.bits,
                                          cout=cout)
        # Zero-pad K rows to the lane-dense width the conv kernel consumes.
        qw = jnp.pad(qw, ((0, k_pad - k), (0, 0)))
        return jax.block_until_ready(qw), jax.block_until_ready(qb)

    def __call__(self, x):
        return self._fwd(x, self.qw, self.qb)


def _reference_forward(weight, bias, x, *, bits, stride, padding, dilation):
    """Pure-JAX reference with the exact PyTorch module semantics (fp32)."""
    cout = weight.shape[0]
    w2 = weight.reshape(cout, -1)
    if bits == 0:
        qw = jnp.zeros_like(weight)
    else:
        ch_max = w2.max(axis=1).reshape(cout, 1, 1, 1)
        ch_min = w2.min(axis=1).reshape(cout, 1, 1, 1)
        rng = jnp.where(ch_max - ch_min == 0.0, 1.0, ch_max - ch_min)
        s_w = rng / (2.0 ** bits - 1.0)
        qw = jnp.round(weight / s_w) * s_w
    s_b = (bias.max() - bias.min()) / (2.0 ** 32 - 1.0)
    qb = jnp.round(bias / s_b) * s_b
    out = jax.lax.conv_general_dilated(
        x, qw, window_strides=(stride, stride),
        padding=[(padding, padding)] * 2,
        rhs_dilation=(dilation, dilation),
        dimension_numbers=('NCHW', 'OIHW', 'NCHW'),
        precision=jax.lax.Precision.HIGHEST)
    return out + qb.reshape(1, cout, 1, 1)


if __name__ == "__main__":
    root = jax.random.PRNGKey(0)
    keys = jax.random.split(root, 4)

    def run_case(name, *, n, cin, h, w, cout, ksz, bits, padding, dilation,
                 key, tol=2e-2):
        k_param, k_x = jax.random.split(key)
        mod = QuantMixChanConv2dPallas(
            inplane=cin, outplane=cout, bits=bits, kernel_size=ksz, stride=1,
            padding=padding, dilation=dilation, groups=1, key=k_param)
        x = jax.random.normal(k_x, (n, cin, h, w), jnp.float32)
        out = jax.block_until_ready(mod(x))
        ref = jax.block_until_ready(_reference_forward(
            mod.weight, mod.bias, x, bits=bits, stride=1, padding=padding,
            dilation=dilation))
        assert out.shape == ref.shape, (name, out.shape, ref.shape)
        assert out.dtype == jnp.float32
        # bf16 MXU operands (fp32 accumulation) vs fp32 reference -> modest tol.
        err = float(jnp.max(jnp.abs(out - ref)))
        assert jnp.allclose(out, ref, atol=tol, rtol=tol), (name, err)

    # (a) base case at the module-spec shapes.
    run_case("base", n=2, cin=4, h=16, w=16, cout=8, ksz=3, bits=4,
             padding=1, dilation=1, key=keys[0])
    # (b) exercises Ho row-block tiling (2 row blocks) and dilation.
    run_case("row_blocks_dilation", n=1, cin=4, h=32, w=32, cout=16, ksz=3,
             bits=6, padding=2, dilation=2, key=keys[1])
    # (c) exercises Cout-block tiling (3 cout blocks) + patch reuse across them.
    run_case("cout_blocks", n=1, cin=4, h=16, w=16, cout=384, ksz=3, bits=4,
             padding=1, dilation=1, key=keys[2])
    # (d) bits == 0 branch (weights quantize to all-zeros -> output == bias).
    run_case("bits0", n=1, cin=4, h=16, w=16, cout=8, ksz=3, bits=0,
             padding=1, dilation=1, key=keys[3])

    print("KERNEL_OK")
</pallas_src>

<mosaic_0001>
module attributes {stable_mosaic.version = 11 : i64} {
  func.func @_quant_kernel(%arg0: i32, %arg1: memref<36x128xf32, #tpu.memory_space<vmem>>, %arg2: memref<1x128xf32, #tpu.memory_space<vmem>>, %arg3: memref<1x128xf32, #tpu.memory_space<vmem>>, %arg4: memref<36x128xbf16, #tpu.memory_space<vmem>>, %arg5: memref<1x128xf32, #tpu.memory_space<vmem>>) attributes {dimension_semantics = [#tpu.dimension_semantics<parallel>], iteration_bounds = array<i64: 1>, scalar_prefetch = 0 : i64, scratch_operands = 0 : i64, tpu.core_type = #tpu.core_type<tc>, window_params = [{transform_indices = @transform_0, window_bounds = array<i64: 36, 128>}, {pipeline_mode = #tpu.pipeline_mode<synchronous>, transform_indices = @transform_1, window_bounds = array<i64: 1, 128>}, {transform_indices = @transform_2, window_bounds = array<i64: 1, 128>}, {transform_indices = @transform_3, window_bounds = array<i64: 36, 128>}, {transform_indices = @transform_4, window_bounds = array<i64: 1, 128>}]} {
    %c0 = arith.constant 0 : index
    %c0_0 = arith.constant 0 : index
    %0 = vector.load %arg1[%c0, %c0_0] : memref<36x128xf32, #tpu.memory_space<vmem>>, vector<36x128xf32>
    %cst = arith.constant dense<0xFF800000> : vector<128xf32>
    %1 = vector.multi_reduction <maximumf>, %0, %cst [0] : vector<36x128xf32> to vector<128xf32>
    %2 = vector.shape_cast %1 : vector<128xf32> to vector<1x128xf32>
    %cst_1 = arith.constant dense<0x7F800000> : vector<128xf32>
    %3 = vector.multi_reduction <minimumf>, %0, %cst_1 [0] : vector<36x128xf32> to vector<128xf32>
    %4 = vector.shape_cast %3 : vector<128xf32> to vector<1x128xf32>
    %5 = arith.subf %2, %4 : vector<1x128xf32>
    %cst_2 = arith.constant 0.000000e+00 : f32
    %6 = vector.broadcast %cst_2 : f32 to vector<1x128xf32>
    %7 = arith.cmpf oeq, %5, %6 : vector<1x128xf32>
    %cst_3 = arith.constant 1.000000e+00 : f32
    %8 = vector.broadcast %cst_3 : f32 to vector<1x128xf32>
    %9 = arith.select %7, %8, %5 : vector<1x128xi1>, vector<1x128xf32>
    %cst_4 = arith.constant 1.500000e+01 : f32
    %10 = vector.broadcast %cst_4 : f32 to vector<1x128xf32>
    %11 = arith.divf %9, %10 : vector<1x128xf32>
    %12 = vector.broadcast %11 : vector<1x128xf32> to vector<36x128xf32>
    %13 = arith.divf %0, %12 : vector<36x128xf32>
    %14 = math.roundeven %13 : vector<36x128xf32>
    %15 = vector.broadcast %11 : vector<1x128xf32> to vector<36x128xf32>
    %16 = arith.mulf %14, %15 : vector<36x128xf32>
    %17 = arith.truncf %16 : vector<36x128xf32> to vector<36x128xbf16>
    %c0_5 = arith.constant 0 : index
    %c0_6 = arith.constant 0 : index
    %18 = vector.load %arg4[%c0_5, %c0_6] : memref<36x128xbf16, #tpu.memory_space<vmem>>, vector<36x128xbf16>
    tpu.vector_store %arg4[%c0_5, %c0_6], %17 {strides = array<i32>} : memref<36x128xbf16, #tpu.memory_space<vmem>>, vector<36x128xbf16>,
    %c0_7 = arith.constant 0 : index
    %c0_8 = arith.constant 0 : index
    %19 = vector.load %arg2[%c0_7, %c0_8] : memref<1x128xf32, #tpu.memory_space<vmem>>, vector<1x128xf32>
    %20 = tpu.iota {dimensions = array<i32: 1>} : vector<1x128xi32>
    %c8_i32 = arith.constant 8 : i32
    %21 = vector.broadcast %c8_i32 : i32 to vector<1x128xi32>
    %22 = arith.cmpi slt, %20, %21 : vector<1x128xi32>
    %cst_9 = arith.constant 0xFF800000 : f32
    %23 = vector.broadcast %cst_9 : f32 to vector<1x128xf32>
    %24 = arith.select %22, %19, %23 : vector<1x128xi1>, vector<1x128xf32>
    %cst_10 = arith.constant dense<0xFF800000> : vector<1xf32>
    %25 = vector.multi_reduction <maximumf>, %24, %cst_10 [1] : vector<1x128xf32> to vector<1xf32>
    %26 = vector.shape_cast %25 : vector<1xf32> to vector<1x1xf32>
    %cst_11 = arith.constant 0x7F800000 : f32
    %27 = vector.broadcast %cst_11 : f32 to vector<1x128xf32>
    %28 = arith.select %22, %19, %27 : vector<1x128xi1>, vector<1x128xf32>
    %cst_12 = arith.constant dense<0x7F800000> : vector<1xf32>
    %29 = vector.multi_reduction <minimumf>, %28, %cst_12 [1] : vector<1x128xf32> to vector<1xf32>
    %30 = vector.shape_cast %29 : vector<1xf32> to vector<1x1xf32>
    %31 = arith.subf %26, %30 : vector<1x1xf32>
    %cst_13 = arith.constant 4.2949673E+9 : f32
    %32 = vector.broadcast %cst_13 : f32 to vector<1x1xf32>
    %33 = arith.divf %31, %32 : vector<1x1xf32>
    %cst_14 = arith.constant 0.000000e+00 : f32
    %34 = vector.broadcast %cst_14 : f32 to vector<1x1xf32>
    %35 = arith.cmpf oeq, %33, %34 : vector<1x1xf32>
    %cst_15 = arith.constant 1.000000e+00 : f32
    %36 = vector.broadcast %cst_15 : f32 to vector<1x1xf32>
    %37 = arith.select %35, %36, %33 : vector<1x1xi1>, vector<1x1xf32>
    %c0_16 = arith.constant 0 : index
    %c0_17 = arith.constant 0 : index
    %38 = vector.load %arg3[%c0_16, %c0_17] : memref<1x128xf32, #tpu.memory_space<vmem>>, vector<1x128xf32>
    %39 = vector.broadcast %37 : vector<1x1xf32> to vector<1x128xf32>
    %40 = arith.divf %38, %39 : vector<1x128xf32>
    %41 = math.roundeven %40 : vector<1x128xf32>
    %42 = vector.broadcast %37 : vector<1x1xf32> to vector<1x128xf32>
    %43 = arith.mulf %41, %42 : vector<1x128xf32>
    %c128_i32 = arith.constant 128 : i32
    %44 = arith.muli %arg0, %c128_i32 : i32
    %45 = tpu.iota {dimensions = array<i32: 1>} : vector<1x128xi32>
    %46 = vector.broadcast %44 : i32 to vector<1x128xi32>
    %47 = arith.addi %46, %45 : vector<1x128xi32>
    %c8_i32_18 = arith.constant 8 : i32
    %48 = vector.broadcast %c8_i32_18 : i32 to vector<1x128xi32>
    %49 = arith.cmpi slt, %47, %48 : vector<1x128xi32>
    %cst_19 = arith.constant 0.000000e+00 : f32
    %50 = vector.broadcast %cst_19 : f32 to vector<1x128xf32>
    %51 = arith.select %49, %43, %50 : vector<1x128xi1>, vector<1x128xf32>
    %c0_20 = arith.constant 0 : index
    %c0_21 = arith.constant 0 : index
    %52 = vector.load %arg5[%c0_20, %c0_21] : memref<1x128xf32, #tpu.memory_space<vmem>>, vector<1x128xf32>
    tpu.vector_store %arg5[%c0_20, %c0_21], %51 {strides = array<i32>} : memref<1x128xf32, #tpu.memory_space<vmem>>, vector<1x128xf32>,
    return
  }
  func.func @transform_0(%arg0: i32) -> (i32, i32) {
    %c0_i32 = arith.constant 0 : i32
    %c0_i32_0 = arith.constant 0 : i32
    return %c0_i32, %arg0 : i32, i32
  }
  func.func @transform_1(%arg0: i32) -> (i32, i32) {
    %c0_i32 = arith.constant 0 : i32
    %c0_i32_0 = arith.constant 0 : i32
    %c0_i32_1 = arith.constant 0 : i32
    return %c0_i32, %c0_i32_0 : i32, i32
  }
  func.func @transform_2(%arg0: i32) -> (i32, i32) {
    %c0_i32 = arith.constant 0 : i32
    %c0_i32_0 = arith.constant 0 : i32
    return %c0_i32, %arg0 : i32, i32
  }
  func.func @transform_3(%arg0: i32) -> (i32, i32) {
    %c0_i32 = arith.constant 0 : i32
    %c0_i32_0 = arith.constant 0 : i32
    return %c0_i32, %arg0 : i32, i32
  }
  func.func @transform_4(%arg0: i32) -> (i32, i32) {
    %c0_i32 = arith.constant 0 : i32
    %c0_i32_0 = arith.constant 0 : i32
    return %c0_i32, %arg0 : i32, i32
  }
}

</mosaic_0001>

<bundles_post_ra>
// kernel: tpu_custom_call.1
= control target key start
LH: loop header
LB: loop body
LE: loop exit
PB: predicated region body
PF: predicated region fallthrough
CT: control target
= control target key end

     0   :  { %10 = vsyncpa [#allocation3], 0  ;;  %s360_s0 = inlined_call_operand.hbm [shape: f32[36,128], index: 0, kind: input, shape index: {}]   ;;  %s361_s1 = inlined_call_operand.vmem [shape: f32[1,128], index: 1, kind: input, shape index: {}]   ;;  %s362_s2 = inlined_call_operand.vmem [shape: f32[1,128], index: 2, kind: input, shape index: {}]   ;;  %s363_s3 = inlined_call_operand.hbm [shape: bf16[36,128], index: 3, kind: output, shape index: {0}]   ;;  %s364_s4 = inlined_call_operand.hbm [shape: f32[1,128], index: 4, kind: output, shape index: {1}]  }
   0x1   :  { %11 = vsyncpa [#allocation4], 0 }
   0x2   :  { %12 = vsyncpa [#allocation7], 0  ;;  %s277_s15 = smov [#allocation2]   ;;  %s205_s19 = scalar_lea.hbm %s360_s0, 640 }
   0x3   :  { %s18_s16 = sshll.u32 %s277_s15, 4  ;;  %p206_p0 = scmp.ne.s32.totalorder %s360_s0, %s205_s19  ;;  %s19_s16 = int_to_ptr.vmem [resolvable:$true] %s18_s16 }
   0x4   :  { %p209_p1 = scmp.lt.u32.totalorder %s205_s19, %s360_s0 }
   0x6   :  { %p211_p2 = pnand %p209_p1, %p206_p0 }
   0x8   :  { %214 = shalt.err (!%p211_p2)
}
   0x9   :  { %s215_s24 = scalar_lea.vmem %s19_s16, 640  ;;  %p220_p4 = scmp.lt.s32.totalorder %s19_s16, %s19_s16 }
   0xa   :  { %p216_p3 = scmp.ne.s32.totalorder %s19_s16, %s215_s24  ;;  %p221_p5 = scmp.lt.s32.totalorder %s215_s24, %s215_s24 }
   0xc   :  { %p222_p6 = por %p221_p5, %p220_p4 }
   0xe   :  { %p223_p7 = pnand %p222_p6, %p216_p3 }
  0x10   :  { %226 = shalt.err (!%p223_p7)
}
  0x11   :  { %s278_s25 = smov 128   ;;  %s279_s26 = smov 8  }
  0x12   :  { %24 = dma.hbm_to_vmem [thread:$0]  %s360_s0, 640, %s19_s16, [#allocation3], %s278_s25, %s278_s25, %s279_s26  }
  0x13   :  { %271 = dma.done.wait [#allocation3], 640  }
  0x14   :  { %272 = vsyncadd [#allocation3], 4294966656  ;;  %v108_v0 = vlaneseq  ;;  %vm112_vm1 = vcmask 1040384   ;;  %v107_v2 = vld [vmem:[%s361_s1] sm:$0x1]  ;;  %vm37_vm2 = vcmask 1043456  }
  0x15   :  { %v36_v3 = vld [vmem:[#allocation2 + $0x20] sm:$0xf]  ;;  %v33_v13 = vld [vmem:[#allocation2 + $0x8] sm:$0xff]  ;;  %v34_v14 = vld [vmem:[#allocation2 + $0x10] sm:$0xff]  ;;  %s280_s0 = smov [#allocation5]  }
  0x16   :  { %v321_v1 = vand.u32 127, %v108_v0  ;;  %v32_v6 = vld [vmem:[#allocation2] sm:$0xff]  ;;  %v38_v7 = vsel %vm37_vm2, %v36_v3, -inf  ;;  %v49_v8 = vsel %vm37_vm2, %v36_v3, inf  ;;  %v35_v15 = vld [vmem:[#allocation2 + $0x18] sm:$0xff]  ;;  %s141_s1 = sshll.u32 %s280_s0, 4  ;;  %s142_s1 = int_to_ptr.vmem [resolvable:$true] %s141_s1 }
  0x17   :  { %v39_v10 = vmax.f32 %v32_v6, %v38_v7  ;;  %v50_v11 = vmin.f32 %v32_v6, %v49_v8  ;;  %v41_v17 = vmax.f32 %v34_v14, %v35_v15  ;;  %v52_v19 = vmin.f32 %v34_v14, %v35_v15  ;;  %s227_s5 = scalar_lea.vmem %s142_s1, 320  ;;  %p232_p9 = scmp.lt.s32.totalorder %s142_s1, %s142_s1 }
  0x18   :  { %vm110_vm0 = vcmp.lt.s32.totalorder %v321_v1, 8  ;;  %p228_p8 = scmp.ne.s32.totalorder %s142_s1, %s227_s5  ;;  %p233_p10 = scmp.lt.s32.totalorder %s227_s5, %s227_s5 }
  0x19   :  { %v111_v4 = vsel %vm110_vm0, %v107_v2, -inf  ;;  %v116_v5 = vsel %vm110_vm0, %v107_v2, inf  ;;  %v40_v16 = vmax.f32 %v39_v10, %v33_v13  ;;  %v51_v18 = vmin.f32 %v50_v11, %v33_v13 }
  0x1a   :  { %v113_v9 = vsel %vm112_vm1, %v111_v4, -inf  ;;  %v117_v12 = vsel %vm112_vm1, %v116_v5, inf  ;;  %p234_p11 = por %p233_p10, %p232_p9 }
  0x1b   :  { %114 = vmax.xlane.f32.xlu0 %v113_v9  ;;  %v42_v20 = vmax.f32 %v40_v16, %v41_v17  ;;  %v53_v21 = vmin.f32 %v51_v18, %v52_v19 }
  0x1c   :  { %p235_p12 = pnand %p234_p11, %p228_p8 }
  0x1d   :  { %v43_v22 = vrot.slane %v42_v20, 4  ;;  %v54_v23 = vrot.slane %v53_v21, 4 }
  0x1f   :  { %118 = vmin.xlane.f32.xlu0 %v117_v12  ;;  %v44_v24 = vmax.f32 %v42_v20, %v43_v22  ;;  %v55_v25 = vmin.f32 %v53_v21, %v54_v23 }
  0x21   :  { %v45_v26 = vrot.slane %v44_v24, 2  ;;  %v56_v27 = vrot.slane %v55_v25, 2 }
  0x23   :  { %v46_v28 = vmax.f32 %v44_v24, %v45_v26  ;;  %v57_v29 = vmin.f32 %v55_v25, %v56_v27 }
  0x25   :  { %v47_v30 = vrot.slane %v46_v28, 1  ;;  %v58_v31 = vrot.slane %v57_v29, 1 }
  0x27   :  { %v48_v32 = vmax.f32 %v46_v28, %v47_v30  ;;  %v59_v33 = vmin.f32 %v57_v29, %v58_v31 }
  0x29   :  { %v60_v34 = vsub.f32 %v48_v32, %v59_v33 }
  0x2b   :  { %vm61_vm3 = vcmp.eq.f32.partialorder %v60_v34, 0.0 }
  0x2c   :  { %v62_v35 = vsel %vm61_vm3, 1.0, %v60_v34 }
  0x2d   :  { %v64_v36 = vmul.f32 0.06666667, %v62_v35 }
  0x2f   :  { %201 = vrcp.f32 %v64_v36 }
  0x39   :  { %v202_v37 = vpop.eup %201 }
  0x3a   :  { %v66_v38 = vmul.f32 %v202_v37, %v32_v6  ;;  %v67_v39 = vmul.f32 %v202_v37, %v33_v13  ;;  %v68_v40 = vmul.f32 %v202_v37, %v34_v14  ;;  %v69_v41 = vmul.f32 %v202_v37, %v35_v15 }
  0x3b   :  { %v70_v42 = vmul.f32 %v202_v37, %v36_v3 }
  0x3c   :  { %v188_v43 = vround.rtne.f32 %v66_v38  ;;  %v189_v44 = vround.rtne.f32 %v67_v39  ;;  %v190_v45 = vround.rtne.f32 %v68_v40  ;;  %v191_v46 = vround.rtne.f32 %v69_v41 }
  0x3d   :  { %v192_v47 = vround.rtne.f32 %v70_v42 }
  0x3e   :  { %v76_v48 = vmul.f32 %v188_v43, %v64_v36  ;;  %v77_v49 = vmul.f32 %v189_v44, %v64_v36  ;;  %v78_v50 = vmul.f32 %v190_v45, %v64_v36  ;;  %v79_v51 = vmul.f32 %v191_v46, %v64_v36 }
  0x3f   :  { %v80_v52 = vmul.f32 %v192_v47, %v64_v36 }
  0x40   :  { %v180_v53 = vpack.c.bf16 %v77_v49, %v76_v48  ;;  %v185_v54 = vpack.c.bf16 %v79_v51, %v78_v50 }
  0x41   :  { %v176_v55 = vpack.c.bf16 %v80_v52, %v80_v52 }
  0x42   :  { %181 = vst [vmem:[#allocation5] sm:$0xff] %v180_v53   ;;  %187 = vst [vmem:[#allocation5 + $0x8] sm:$0xff] %v185_v54  }
  0x43   :  { %106 = vst [vmem:[#allocation5 + $0x10] sm:$0x3] %v176_v55 }
  0x44   :  { %238 = shalt.err (!%p235_p12)
}
  0x45   :  { %s239_s8 = scalar_lea.hbm %s363_s3, 320 }
  0x46   :  { %p240_p13 = scmp.ne.s32.totalorder %s363_s3, %s239_s8  ;;  %p243_p0 = scmp.lt.u32.totalorder %s239_s8, %s363_s3 }
  0x48   :  { %p245_p1 = pnand %p243_p0, %p240_p13 }
  0x4a   :  { %248 = shalt.err (!%p245_p1)
}
  0x4b   :  { %s281_s13 = smov 64   ;;  %s282_s14 = smov 4   ;;  %v125_v61 = vld [vmem:[%s362_s2] sm:$0x1] }
  0x4c   :  { %147 = dma.vmem_to_hbm [thread:$0]  %s142_s1, 320, %s363_s3, [#allocation4], %s281_s13, %s281_s13, %s282_s14  }
  0x4d   :  { %s283_s19 = smov [#allocation6]  }
  0x4e   :  { %s154_s20 = sshll.u32 %s283_s19, 4  ;;  %s155_s20 = int_to_ptr.vmem [resolvable:$true] %s154_s20 }
  0x4f   :  { %s249_s3 = scalar_lea.vmem %s155_s20, 16  ;;  %s253_s21 = scalar_lea.vmem %s155_s20, 32 }
  0x50   :  { %p250_p2 = scmp.ne.s32.totalorder %s155_s20, %s249_s3  ;;  %p254_p3 = scmp.lt.s32.totalorder %s155_s20, %s155_s20 }
  0x51   :  { %p255_p4 = scmp.lt.s32.totalorder %s253_s21, %s249_s3 }
  0x53   :  { %p256_p5 = por %p255_p4, %p254_p3 }
  0x55   :  { %p257_p6 = pnand %p256_p5, %p250_p2 }
  0xa8   :  { %v115_v56 = vpop.xlane.xlu0 %114 }
  0xac   :  { %v119_v57 = vpop.xlane.xlu0 %118 }
  0xad   :  { %v120_v58 = vsub.f32 %v115_v56, %v119_v57 }
  0xaf   :  { %v122_v59 = vmul.f32 2.3283064e-10, %v120_v58 }
  0xb1   :  { %vm123_vm4 = vcmp.eq.f32.partialorder %v122_v59, 0.0 }
  0xb2   :  { %v124_v60 = vsel %vm123_vm4, 1.0, %v122_v59 }
  0xb3   :  { %203 = vrcp.f32 %v124_v60 }
  0xbd   :  { %v204_v62 = vpop.eup %203 }
  0xbe   :  { %v127_v63 = vmul.f32 %v204_v62, %v125_v61 }
  0xc0   :  { %v193_v0 = vround.rtne.f32 %v127_v63 }
  0xc2   :  { %v129_v2 = vmul.f32 %v193_v0, %v124_v60 }
  0xc4   :  { %v134_v3 = vsel %vm110_vm0, %v129_v2, 0.0 }
  0xc5   :  { %135 = vst [vmem:[#allocation6] sm:$0x1] %v134_v3 }
  0xc6   :  { %260 = shalt.err (!%p257_p6)
}
  0xc7   :  { %s261_s23 = scalar_lea.hbm %s364_s4, 16 }
  0xc8   :  { %p262_p7 = scmp.ne.s32.totalorder %s364_s4, %s261_s23  ;;  %p265_p8 = scmp.lt.u32.totalorder %s261_s23, %s364_s4 }
  0xca   :  { %p267_p9 = pnand %p265_p8, %p262_p7 }
  0xcc   :  { %270 = shalt.err (!%p267_p9)
}
  0xcd   :  { %157 = dma.vmem_to_hbm [thread:$0]  %s155_s20, 16, %s364_s4, [#allocation7]  }
  0xce   :  { %273 = dma.done.wait [#allocation4], 320  }
  0xcf   :  { %274 = vsyncadd [#allocation4], 4294966976 }
  0xd0   :  { %275 = dma.done.wait [#allocation7], 16  }
  0xd1   :  { %276 = vsyncadd [#allocation7], 4294967280 }
  0xd2   :  { %164 = vsyncpa [#allocation3], 1 }
  0xd3   :  { %165 = vsyncpa [#allocation4], 1 }
  0xd4   :  { %166 = vsyncpa [#allocation7], 1 }

</bundles_post_ra>
